<compile_context>
chip_gen: v7x
topology: tpu7x:2x2x1
jax: 0.10.0
libtpu: 0.0.40
codegen_flags: <defaults>
</compile_context>

<pallas_src>
import functools

import jax
import jax.numpy as jnp
from jax.experimental import pallas as pl
from jax.experimental.pallas import tpu as pltpu


def _round_up(x: int, m: int) -> int:
    return m * ((x + m - 1) // m)


def _get_normalized_dim(dim: int, multiple_of: int) -> int:
    # Mirror of get_normalized_dim: round hidden dim up to a multiple.
    return _round_up(dim, multiple_of)


def mlp_kernel(x_ref, w1_ref, b1_ref, w2_ref, b2_ref, o_ref, *, approx_recip):
    # Layer 1: x @ W1^T computed as x @ W1t (W1t pre-transposed in the wrapper,
    # amortized once per call — no per-tile weight transpose in the body).
    h = jnp.dot(x_ref[...], w1_ref[...], preferred_element_type=jnp.float32)

    # Bias add + SiLU in the pointwise dtype (bf16 on the bf16 path: 2x VALU/EUP
    # throughput and half the vreg pressure on v6e/v7x; f32 on the default path).
    h = h.astype(b1_ref.dtype) + b1_ref[...]

    # SiLU: h * sigmoid(h), sigmoid(h) = 1 / (1 + exp(-h)).
    # exp (and the approx reciprocal) execute on the EUP slot.
    denom = 1.0 + jnp.exp(-h)
    if approx_recip:
        sig = pl.reciprocal(denom.astype(jnp.float32), approx=True).astype(h.dtype)
    else:
        sig = (1.0 / denom).astype(h.dtype)
    h = h * sig

    # Layer 2: h @ W2^T computed as h @ W2t (pre-transposed, lane-padded to a
    # multiple of 128 so the output store is lane-dense).
    out = jnp.dot(h.astype(w2_ref.dtype), w2_ref[...],
                  preferred_element_type=jnp.float32)
    out = out + b2_ref[...]                      # f32 bias on the f32 accumulator
    o_ref[...] = out.astype(o_ref.dtype)


def mlp_forward(x, w1, b1, w2, b2, *, use_bf16=False, approx_sigmoid=None,
                tb=None, allow_xla_fallback=False):
    """x: (B, D_in); w1: (D_hid, D_in); b1: (D_hid,); w2: (D_out, D_hid); b2: (D_out,)."""
    B, d_in = x.shape
    d_hid = w1.shape[0]
    d_out = w2.shape[0]
    out_dtype = x.dtype

    if approx_sigmoid is None:
        approx_sigmoid = bool(use_bf16)

    # Optional bypass for problems too small to amortize pallas_call overhead
    # (grid=1, a few vregs of data): plain XLA fusion wins there.
    if allow_xla_fallback and B <= 8 and max(d_in, d_hid, d_out) <= 256:
        h = x @ w1.T + b1
        h = h * jax.nn.sigmoid(h)
        return h @ w2.T + b2

    compute_dtype = jnp.bfloat16 if use_bf16 else x.dtype
    pointwise_dtype = jnp.bfloat16 if use_bf16 else jnp.float32

    # ---- wrapper-side layout prep (one-time per call, amortized over tiles) ----
    d_out_pad = _round_up(d_out, 128)                     # lane-dense output stores
    w1t = jnp.transpose(w1).astype(compute_dtype)         # (d_in, d_hid)
    w2t = jnp.transpose(w2).astype(compute_dtype)         # (d_hid, d_out)
    b2p = b2
    if d_out_pad != d_out:
        w2t = jnp.pad(w2t, ((0, 0), (0, d_out_pad - d_out)))
        b2p = jnp.pad(b2, (0, d_out_pad - d_out))
    b1_r = b1.astype(pointwise_dtype).reshape(1, d_hid)   # bias in pointwise dtype
    b2_r = b2p.astype(jnp.float32).reshape(1, d_out_pad)  # added to f32 accumulator
    xc = x.astype(compute_dtype)

    in_item = jnp.dtype(compute_dtype).itemsize
    pw_item = jnp.dtype(pointwise_dtype).itemsize
    out_item = jnp.dtype(out_dtype).itemsize

    # ---- batch tiling -------------------------------------------------------
    if tb is None:
        # Bytes per batch row: double-buffered x/out tiles + hidden temporaries.
        row_bytes = 2 * (d_in * in_item + d_out_pad * out_item) + d_hid * (4 + pw_item)
        act_budget = 24 << 20                              # v7x-safe activation slice of VMEM
        tb = min(512, max(8, act_budget // max(row_bytes, 1)))
    tb = int(max(8, min(_round_up(int(tb), 8), _round_up(B, 8))))
    if B >= 16:
        # Keep >= 2 grid steps when the batch allows it: enables activation
        # pipelining and megacore sharding on v7x.
        tb = min(tb, _round_up(-(-B // 2), 8))
    grid_b = -(-B // tb)                                   # cdiv; last block masked by Pallas

    # ---- VMEM budget --------------------------------------------------------
    weight_bytes = (d_in * d_hid + d_hid * d_out_pad) * in_item   # single-buffered (resident)
    bias_bytes = d_hid * pw_item + d_out_pad * 4
    act_bytes = 2 * tb * (d_in * in_item + d_out_pad * out_item)  # double-buffered x / out tiles
    temp_bytes = tb * d_hid * (4 + pw_item)                        # f32 acc + pointwise hidden
    needed = weight_bytes + bias_bytes + act_bytes + temp_bytes
    try:
        vmem_cap = pltpu.get_tpu_info().vmem_capacity_bytes
    except Exception:
        vmem_cap = 64 << 20                                        # conservative (v7x per-TC)
    vmem_limit = int(min(max(2 * needed, 32 << 20), int(0.9 * vmem_cap), 100 << 20))

    kernel = functools.partial(mlp_kernel, approx_recip=approx_sigmoid)

    out_pad = pl.pallas_call(
        kernel,
        out_shape=jax.ShapeDtypeStruct((B, d_out_pad), out_dtype),
        grid=(grid_b,),
        in_specs=[
            # Activations: pipelined (double-buffered) batch tiles.
            pl.BlockSpec((tb, d_in), lambda i: (i, 0)),
            # Grid-invariant weights / biases: whole-array VMEM residents,
            # single-buffered, DMA'd once (not re-fetched per grid step).
            pl.BlockSpec(memory_space=pltpu.MemorySpace.VMEM),   # W1t
            pl.BlockSpec(memory_space=pltpu.MemorySpace.VMEM),   # b1
            pl.BlockSpec(memory_space=pltpu.MemorySpace.VMEM),   # W2t
            pl.BlockSpec(memory_space=pltpu.MemorySpace.VMEM),   # b2
        ],
        out_specs=pl.BlockSpec((tb, d_out_pad), lambda i: (i, 0)),
        compiler_params=pltpu.CompilerParams(
            # Batch tiles are independent; shardable across TensorCores on v7x.
            dimension_semantics=("parallel",),
            vmem_limit_bytes=vmem_limit,
        ),
    )(xc, w1t, b1_r, w2t, b2_r)

    return out_pad[:, :d_out] if d_out_pad != d_out else out_pad


def reference_forward(x, w1, b1, w2, b2):
    h = x @ w1.T + b1
    h = h * jax.nn.sigmoid(h)
    return h @ w2.T + b2


if __name__ == "__main__":
    # Module config: input_dim=32, hidden_dim=None -> 4*32=128 (multiple of 8),
    # output_dim=None -> 32, activation='silu', bias=True.
    input_dim = 32
    hidden_dim = _get_normalized_dim(input_dim * 4, 8)   # 128
    output_dim = input_dim                                # 32

    key = jax.random.PRNGKey(0)
    kx, kw1, kb1, kw2, kb2, kx2 = jax.random.split(key, 6)

    # Deterministic PyTorch-Linear-style init: U(-1/sqrt(fan_in), 1/sqrt(fan_in)).
    bound1 = 1.0 / (input_dim ** 0.5)
    bound2 = 1.0 / (hidden_dim ** 0.5)
    w1 = jax.random.uniform(kw1, (hidden_dim, input_dim), jnp.float32, -bound1, bound1)
    b1 = jax.random.uniform(kb1, (hidden_dim,), jnp.float32, -bound1, bound1)
    w2 = jax.random.uniform(kw2, (output_dim, hidden_dim), jnp.float32, -bound2, bound2)
    b2 = jax.random.uniform(kb2, (output_dim,), jnp.float32, -bound2, bound2)

    # 1) Small single-tile case (grid=1), exact f32 semantics of the module.
    x_small = jax.random.normal(kx, (8, input_dim), jnp.float32)
    ref_s = reference_forward(x_small, w1, b1, w2, b2)
    out_s = jax.block_until_ready(mlp_forward(x_small, w1, b1, w2, b2))
    assert out_s.shape == (8, output_dim)
    assert jnp.allclose(out_s, ref_s, atol=1e-5, rtol=1e-5), "f32 small-batch mismatch"

    # 2) Larger ragged batch (grid>1): exercises pipelined activation tiles and
    #    the masked partial last block (no wrapper-side padding of x).
    x_big = jax.random.normal(kx2, (200, input_dim), jnp.float32)
    ref_b = reference_forward(x_big, w1, b1, w2, b2)
    out_b = jax.block_until_ready(mlp_forward(x_big, w1, b1, w2, b2))
    assert out_b.shape == (200, output_dim)
    assert jnp.allclose(out_b, ref_b, atol=1e-5, rtol=1e-5), "f32 ragged-batch mismatch"

    # 3) bf16 compute path: bf16 MXU inputs + bf16 pointwise, f32 accumulation,
    #    approx EUP reciprocal in the sigmoid. Looser tolerance.
    out_bf16 = jax.block_until_ready(mlp_forward(x_big, w1, b1, w2, b2, use_bf16=True))
    assert out_bf16.shape == (200, output_dim)
    assert jnp.allclose(out_bf16, ref_b, atol=5e-2, rtol=5e-2), "bf16 path mismatch"

    print("KERNEL_OK")
</pallas_src>

<mosaic_0001>
module attributes {stable_mosaic.version = 11 : i64} {
  func.func @mlp_kernel(%arg0: i32, %arg1: memref<8x32xf32, #tpu.memory_space<vmem>>, %arg2: memref<32x128xf32, #tpu.memory_space<vmem>>, %arg3: memref<1x128xf32, #tpu.memory_space<vmem>>, %arg4: memref<128x128xf32, #tpu.memory_space<vmem>>, %arg5: memref<1x128xf32, #tpu.memory_space<vmem>>, %arg6: memref<8x128xf32, #tpu.memory_space<vmem>>) attributes {dimension_semantics = [#tpu.dimension_semantics<parallel>], iteration_bounds = array<i64: 1>, scalar_prefetch = 0 : i64, scratch_operands = 0 : i64, tpu.core_type = #tpu.core_type<tc>, window_params = [{transform_indices = @transform_0, window_bounds = array<i64: 8, 32>}, {pipeline_mode = #tpu.pipeline_mode<synchronous>, transform_indices = @transform_1, window_bounds = array<i64: 32, 128>}, {pipeline_mode = #tpu.pipeline_mode<synchronous>, transform_indices = @transform_2, window_bounds = array<i64: 1, 128>}, {pipeline_mode = #tpu.pipeline_mode<synchronous>, transform_indices = @transform_3, window_bounds = array<i64: 128, 128>}, {pipeline_mode = #tpu.pipeline_mode<synchronous>, transform_indices = @transform_4, window_bounds = array<i64: 1, 128>}, {transform_indices = @transform_5, window_bounds = array<i64: 8, 128>}]} {
    %c0 = arith.constant 0 : index
    %c0_0 = arith.constant 0 : index
    %0 = vector.load %arg1[%c0, %c0_0] : memref<8x32xf32, #tpu.memory_space<vmem>>, vector<8x32xf32>
    %c0_1 = arith.constant 0 : index
    %c0_2 = arith.constant 0 : index
    %1 = vector.load %arg2[%c0_1, %c0_2] : memref<32x128xf32, #tpu.memory_space<vmem>>, vector<32x128xf32>
    %cst = arith.constant dense<0.000000e+00> : vector<8x128xf32>
    %2 = tpu.matmul %0, %1, %cst {dimension_numbers = #tpu.dot_dimension_numbers<[1], [0], [0], [1], [0, 0, 1, 1], [], []>} : vector<8x32xf32>, vector<32x128xf32>, vector<8x128xf32> -> vector<8x128xf32>
    %c0_3 = arith.constant 0 : index
    %c0_4 = arith.constant 0 : index
    %3 = vector.load %arg3[%c0_3, %c0_4] : memref<1x128xf32, #tpu.memory_space<vmem>>, vector<1x128xf32>
    %4 = vector.broadcast %3 : vector<1x128xf32> to vector<8x128xf32>
    %5 = arith.addf %2, %4 : vector<8x128xf32>
    %cst_5 = arith.constant 0.000000e+00 : f32
    %6 = vector.broadcast %cst_5 : f32 to vector<8x128xf32>
    %7 = arith.subf %6, %5 : vector<8x128xf32>
    %8 = math.exp %7 : vector<8x128xf32>
    %cst_6 = arith.constant 1.000000e+00 : f32
    %9 = vector.broadcast %cst_6 : f32 to vector<8x128xf32>
    %10 = arith.addf %9, %8 : vector<8x128xf32>
    %cst_7 = arith.constant 1.000000e+00 : f32
    %11 = vector.broadcast %cst_7 : f32 to vector<8x128xf32>
    %12 = arith.divf %11, %10 : vector<8x128xf32>
    %13 = arith.mulf %5, %12 : vector<8x128xf32>
    %c0_8 = arith.constant 0 : index
    %c0_9 = arith.constant 0 : index
    %14 = vector.load %arg4[%c0_8, %c0_9] : memref<128x128xf32, #tpu.memory_space<vmem>>, vector<128x128xf32>
    %cst_10 = arith.constant dense<0.000000e+00> : vector<8x128xf32>
    %15 = tpu.matmul %13, %14, %cst_10 {dimension_numbers = #tpu.dot_dimension_numbers<[1], [0], [0], [1], [0, 0, 1, 1], [], []>} : vector<8x128xf32>, vector<128x128xf32>, vector<8x128xf32> -> vector<8x128xf32>
    %c0_11 = arith.constant 0 : index
    %c0_12 = arith.constant 0 : index
    %16 = vector.load %arg5[%c0_11, %c0_12] : memref<1x128xf32, #tpu.memory_space<vmem>>, vector<1x128xf32>
    %17 = vector.broadcast %16 : vector<1x128xf32> to vector<8x128xf32>
    %18 = arith.addf %15, %17 : vector<8x128xf32>
    %c0_13 = arith.constant 0 : index
    %c0_14 = arith.constant 0 : index
    %19 = vector.load %arg6[%c0_13, %c0_14] : memref<8x128xf32, #tpu.memory_space<vmem>>, vector<8x128xf32>
    tpu.vector_store %arg6[%c0_13, %c0_14], %18 {strides = array<i32>} : memref<8x128xf32, #tpu.memory_space<vmem>>, vector<8x128xf32>,
    return
  }
  func.func @transform_0(%arg0: i32) -> (i32, i32) {
    %c0_i32 = arith.constant 0 : i32
    %c0_i32_0 = arith.constant 0 : i32
    return %arg0, %c0_i32 : i32, i32
  }
  func.func @transform_1(%arg0: i32) -> (i32, i32) {
    %c0_i32 = arith.constant 0 : i32
    %c0_i32_0 = arith.constant 0 : i32
    %c0_i32_1 = arith.constant 0 : i32
    return %c0_i32, %c0_i32_0 : i32, i32
  }
  func.func @transform_2(%arg0: i32) -> (i32, i32) {
    %c0_i32 = arith.constant 0 : i32
    %c0_i32_0 = arith.constant 0 : i32
    %c0_i32_1 = arith.constant 0 : i32
    return %c0_i32, %c0_i32_0 : i32, i32
  }
  func.func @transform_3(%arg0: i32) -> (i32, i32) {
    %c0_i32 = arith.constant 0 : i32
    %c0_i32_0 = arith.constant 0 : i32
    %c0_i32_1 = arith.constant 0 : i32
    return %c0_i32, %c0_i32_0 : i32, i32
  }
  func.func @transform_4(%arg0: i32) -> (i32, i32) {
    %c0_i32 = arith.constant 0 : i32
    %c0_i32_0 = arith.constant 0 : i32
    %c0_i32_1 = arith.constant 0 : i32
    return %c0_i32, %c0_i32_0 : i32, i32
  }
  func.func @transform_5(%arg0: i32) -> (i32, i32) {
    %c0_i32 = arith.constant 0 : i32
    %c0_i32_0 = arith.constant 0 : i32
    return %arg0, %c0_i32 : i32, i32
  }
}

</mosaic_0001>

<bundles_post_ra>
// kernel: tpu_custom_call.1
= control target key start
LH: loop header
LB: loop body
LE: loop exit
PB: predicated region body
PF: predicated region fallthrough
CT: control target
= control target key end

     0   :  { %10 = vsyncpa [#allocation3], 0  ;;  %s570_s0 = inlined_call_operand.hbm [shape: f32[8,32], index: 0, kind: input, shape index: {}]   ;;  %s571_s1 = inlined_call_operand.hbm [shape: f32[32,128], index: 1, kind: input, shape index: {}]   ;;  %s572_s2 = inlined_call_operand.vmem [shape: f32[1,128], index: 2, kind: input, shape index: {}]   ;;  %s573_s3 = inlined_call_operand.hbm [shape: f32[128,128], index: 3, kind: input, shape index: {}]   ;;  %s574_s4 = inlined_call_operand.vmem [shape: f32[1,128], index: 4, kind: input, shape index: {}]   ;;  %s575_s5 = inlined_call_operand.hbm [shape: f32[8,128], index: 5, kind: output, shape index: {}]  }
   0x1   :  { %11 = vsyncpa [#allocation6], 0 }
   0x2   :  { %12 = vsyncpa [#allocation4], 0  ;;  %s471_s18 = smov [#allocation5]   ;;  %s377_s22 = scalar_lea.hbm %s571_s1, 512 }
   0x3   :  { %s28_s19 = sshll.u32 %s471_s18, 4  ;;  %p378_p0 = scmp.ne.s32.totalorder %s571_s1, %s377_s22  ;;  %s29_s19 = int_to_ptr.vmem [resolvable:$true] %s28_s19 }
   0x4   :  { %p381_p1 = scmp.lt.u32.totalorder %s377_s22, %s571_s1 }
   0x6   :  { %p383_p2 = pnand %p381_p1, %p378_p0 }
   0x8   :  { %386 = shalt.err (!%p383_p2)
}
   0x9   :  { %s387_s27 = scalar_lea.vmem %s29_s19, 512  ;;  %p392_p4 = scmp.lt.s32.totalorder %s29_s19, %s29_s19 }
   0xa   :  { %p388_p3 = scmp.ne.s32.totalorder %s29_s19, %s387_s27  ;;  %p393_p5 = scmp.lt.s32.totalorder %s387_s27, %s387_s27 }
   0xc   :  { %p394_p6 = por %p393_p5, %p392_p4 }
   0xe   :  { %p395_p7 = pnand %p394_p6, %p388_p3 }
  0x10   :  { %398 = shalt.err (!%p395_p7)
}
  0x11   :  { %s472_s28 = smov 128   ;;  %s473_s29 = smov 8  }
  0x12   :  { %34 = dma.hbm_to_vmem [thread:$0]  %s571_s1, 512, %s29_s19, [#allocation6], %s472_s28, %s472_s28, %s473_s29  }
  0x13   :  { %s474_s7 = smov [#allocation2]   ;;  %s475_s9 = smov [#allocation7]  }
  0x14   :  { %s19_s8 = sshll.u32 %s474_s7, 4  ;;  %s42_s10 = sshll.u32 %s475_s9, 4  ;;  %s20_s8 = int_to_ptr.vmem [resolvable:$true] %s19_s8  ;;  %s43_s10 = int_to_ptr.vmem [resolvable:$true] %s42_s10 }
  0x15   :  { %s399_s13 = scalar_lea.hbm %s570_s0, 128 }
  0x16   :  { %p400_p8 = scmp.ne.s32.totalorder %s570_s0, %s399_s13  ;;  %p403_p9 = scmp.lt.u32.totalorder %s399_s13, %s570_s0 }
  0x18   :  { %p405_p10 = pnand %p403_p9, %p400_p8 }
  0x1a   :  { %408 = shalt.err (!%p405_p10)
}
  0x1b   :  { %s409_s1 = scalar_lea.vmem %s20_s8, 128  ;;  %p414_p12 = scmp.lt.s32.totalorder %s20_s8, %s20_s8 }
  0x1c   :  { %p410_p11 = scmp.ne.s32.totalorder %s20_s8, %s409_s1  ;;  %p415_p13 = scmp.lt.s32.totalorder %s409_s1, %s409_s1 }
  0x1e   :  { %p416_p0 = por %p415_p13, %p414_p12 }
  0x20   :  { %p417_p1 = pnand %p416_p0, %p410_p11 }
  0x22   :  { %420 = shalt.err (!%p417_p1)
}
  0x23   :  { %22 = dma.hbm_to_vmem [thread:$0]  %s570_s0, 128, %s20_s8, [#allocation3]  }
  0x24   :  { %s421_s22 = scalar_lea.hbm %s573_s3, 2048 }
  0x25   :  { %p422_p2 = scmp.ne.s32.totalorder %s573_s3, %s421_s22  ;;  %p425_p3 = scmp.lt.u32.totalorder %s421_s22, %s573_s3 }
  0x27   :  { %p427_p4 = pnand %p425_p3, %p422_p2 }
  0x29   :  { %430 = shalt.err (!%p427_p4)
}
  0x2a   :  { %s431_s27 = scalar_lea.vmem %s43_s10, 2048  ;;  %p436_p6 = scmp.lt.s32.totalorder %s43_s10, %s43_s10 }
  0x2b   :  { %p432_p5 = scmp.ne.s32.totalorder %s43_s10, %s431_s27  ;;  %p437_p7 = scmp.lt.s32.totalorder %s431_s27, %s431_s27 }
  0x2d   :  { %p438_p8 = por %p437_p7, %p436_p6 }
  0x2f   :  { %p439_p9 = pnand %p438_p8, %p432_p5 }
  0x31   :  { %442 = shalt.err (!%p439_p9)
}
  0x32   :  { %48 = dma.hbm_to_vmem [thread:$0]  %s573_s3, 2048, %s43_s10, [#allocation6], %s472_s28, %s472_s28, %s473_s29  }
  0x33   :  { %465 = dma.done.wait [#allocation3], 128  }
  0x34   :  { %466 = vsyncadd [#allocation3], 4294967168 }
  0x35   :  { %467 = dma.done.wait [#allocation6], 2560  }
  0x36   :  { %468 = vsyncadd [#allocation6], 4294964736  ;;  %v476_v0 = vmov 0.0|0.0   ;;  %vm477_vm0 = vmmov 0   ;;  %v478_v1 = vmov 0.0   ;;  %v61_v2 = vld [vmem:[#allocation5] sm:$0xff] }
  0x37   :  { %334 = vmatprep.subr.bf16.mxu0 %v476_v0  ;;  %296 = vmatprep.mubr.msk.f32.mxu0 %vm477_vm0, %v478_v1  ;;  %v62_v3 = vld [vmem:[#allocation5 + $0x8] sm:$0xff]  ;;  %v63_v4 = vld [vmem:[#allocation5 + $0x10] sm:$0xff]  ;;  %v64_v6 = vld [vmem:[#allocation5 + $0x18] sm:$0xff]  ;;  %vm72_vm1 = vcmask 261120   ;;  %s479_s7 = smov [#allocation8]  }
  0x38   :  { %340 = vmatprep.subr.bf16.mxu1 %v476_v0  ;;  %331 = vmatprep.mubr.msk.f32.mxu1 %vm477_vm0, %v478_v1  ;;  %v335_v5 = vpack.c.bf16 %v62_v3, %v61_v2  ;;  %v338_v7 = vpack.c.bf16 %v64_v6, %v63_v4  ;;  %v60_v8 = vld [vmem:[#allocation2] sm:$0xff]  ;;  %v153_v9 = vld [vmem:[#allocation7] sm:$0xff]  ;;  %v154_v10 = vld [vmem:[#allocation7 + $0x8] sm:$0xff]  ;;  %s253_s8 = sshll.u32 %s479_s7, 4  ;;  %s254_s8 = int_to_ptr.vmem [resolvable:$true] %s253_s8 }
  0x39   :  { %v341_v11 = vpack.c.bf16 %v154_v10, %v153_v9  ;;  %v155_v12 = vld [vmem:[#allocation7 + $0x10] sm:$0xff]  ;;  %v156_v13 = vld [vmem:[#allocation7 + $0x18] sm:$0xff]  ;;  %v157_v15 = vld [vmem:[#allocation7 + $0x20] sm:$0xff]  ;;  %p448_p11 = scmp.lt.s32.totalorder %s254_s8, %s254_s8 }
  0x3a   :  { %336 = vmatpush3.bf16.msra.mxu0 %v335_v5  ;;  %v344_v14 = vpack.c.bf16 %v156_v13, %v155_v12  ;;  %v158_v16 = vld [vmem:[#allocation7 + $0x28] sm:$0xff]  ;;  %v159_v18 = vld [vmem:[#allocation7 + $0x30] sm:$0xff]  ;;  %v160_v19 = vld [vmem:[#allocation7 + $0x38] sm:$0xff] }
  0x3b   :  { %337 = vmatprep.subr.bf16.mxu0 %v476_v0  ;;  %342 = vmatpush3.bf16.msra.mxu1 %v341_v11  ;;  %v347_v17 = vpack.c.bf16 %v158_v16, %v157_v15  ;;  %v350_v20 = vpack.c.bf16 %v160_v19, %v159_v18  ;;  %v161_v21 = vld [vmem:[#allocation7 + $0x40] sm:$0xff]  ;;  %v162_v22 = vld [vmem:[#allocation7 + $0x48] sm:$0xff]  ;;  %v163_v24 = vld [vmem:[#allocation7 + $0x50] sm:$0xff] }
  0x3c   :  { %343 = vmatprep.subr.bf16.mxu1 %v476_v0  ;;  %v353_v23 = vpack.c.bf16 %v162_v22, %v161_v21  ;;  %v164_v25 = vld [vmem:[#allocation7 + $0x58] sm:$0xff]  ;;  %v165_v27 = vld [vmem:[#allocation7 + $0x60] sm:$0xff]  ;;  %v166_v28 = vld [vmem:[#allocation7 + $0x68] sm:$0xff] }
  0x3d   :  { %v356_v26 = vpack.c.bf16 %v164_v25, %v163_v24  ;;  %v359_v29 = vpack.c.bf16 %v166_v28, %v165_v27  ;;  %v167_v30 = vld [vmem:[#allocation7 + $0x70] sm:$0xff]  ;;  %v168_v31 = vld [vmem:[#allocation7 + $0x78] sm:$0xff] }
  0x3e   :  { %339 = vmatpush3.bf16.msra.mxu0 %v338_v7  ;;  %v362_v32 = vpack.c.bf16 %v168_v31, %v167_v30  ;;  %v263_v33 = vld [vmem:[%s572_s2] ss:$0 sm:$0xff]  ;;  %s443_s2 = scalar_lea.vmem %s254_s8, 128 }
  0x3f   :  { %345 = vmatpush3.bf16.msra.mxu1 %v344_v14  ;;  %v265_v43 = vld [vmem:[%s574_s4] ss:$0 sm:$0xff]  ;;  %p444_p10 = scmp.ne.s32.totalorder %s254_s8, %s443_s2  ;;  %p449_p12 = scmp.lt.s32.totalorder %s443_s2, %s443_s2 }
  0x40   :  { %346 = vmatprep.subr.bf16.mxu1 %v476_v0 }
  0x41   :  { %297 = vmatmul.mubr.msk.f32.vlgmr.msra.gmra.mrb[0].mxu0 %vm72_vm1, %v60_v8  ;;  %p450_p13 = por %p449_p12, %p448_p11 }
  0x43   :  { %348 = vmatpush3.bf16.msra.mxu1 %v347_v17  ;;  %p451_p0 = pnand %p450_p13, %p444_p10 }
  0x44   :  { %349 = vmatprep.subr.bf16.mxu1 %v476_v0 }
  0x47   :  { %351 = vmatpush3.bf16.msra.mxu1 %v350_v20 }
  0x48   :  { %352 = vmatprep.subr.bf16.mxu1 %v476_v0 }
  0x4b   :  { %354 = vmatpush3.bf16.msra.mxu1 %v353_v23 }
  0x4c   :  { %355 = vmatprep.subr.bf16.mxu1 %v476_v0 }
  0x4f   :  { %357 = vmatpush3.bf16.msra.mxu1 %v356_v26 }
  0x50   :  { %358 = vmatprep.subr.bf16.mxu1 %v476_v0 }
  0x53   :  { %360 = vmatpush3.bf16.msra.mxu1 %v359_v29 }
  0x54   :  { %361 = vmatprep.subr.bf16.mxu1 %v476_v0 }
  0x57   :  { %363 = vmatpush3.bf16.msra.mxu1 %v362_v32 }
 0x114   :  { %v142_v34 = vpop.f32.mrb[0].mxu0 }
 0x115   :  { %v143_v35 = vadd.f32 %v263_v33, %v142_v34  ;;  %v298_v36 = vpop.f32.mrb[1].mxu0 }
 0x117   :  { %v146_v37 = vsub.f32 0.0, %v143_v35 }
 0x119   :  { %v147_v38 = vmul.f32 1.442695, %v146_v37 }
 0x11b   :  { %373 = vpow2.f32 %v147_v38 }
 0x125   :  { %v374_v39 = vpop.eup %373 }
 0x126   :  { %v149_v40 = vadd.f32 1.0, %v374_v39 }
 0x128   :  { %375 = vrcp.f32 %v149_v40 }
 0x132   :  { %v376_v41 = vpop.eup %375 }
 0x133   :  { %v152_v42 = vmul.f32 %v376_v41, %v143_v35 }
 0x135   :  { %332 = vmatmul.mubr.f32.vlgmr.msra.gmra.mrb[0].mxu1 %v152_v42 }
 0x208   :  { %v242_v44 = vpop.f32.mrb[0].mxu1 }
 0x209   :  { %v243_v45 = vadd.f32 %v265_v43, %v242_v44  ;;  %v333_v46 = vpop.f32.mrb[1].mxu1 }
 0x20b   :  { %246 = vst [vmem:[#allocation8] sm:$0xff] %v243_v45 }
 0x20c   :  { %454 = shalt.err (!%p451_p0)
}
 0x20d   :  { %s455_s11 = scalar_lea.hbm %s575_s5, 128 }
 0x20e   :  { %p456_p1 = scmp.ne.s32.totalorder %s575_s5, %s455_s11  ;;  %p459_p2 = scmp.lt.u32.totalorder %s455_s11, %s575_s5 }
 0x210   :  { %p461_p3 = pnand %p459_p2, %p456_p1 }
 0x212   :  { %464 = shalt.err (!%p461_p3)
}
 0x213   :  { %256 = dma.vmem_to_hbm [thread:$0]  %s254_s8, 128, %s575_s5, [#allocation4]  }
 0x214   :  { %469 = dma.done.wait [#allocation4], 128  }
 0x215   :  { %470 = vsyncadd [#allocation4], 4294967168 }
 0x216   :  { %260 = vsyncpa [#allocation3], 1 }
 0x217   :  { %261 = vsyncpa [#allocation6], 1 }
 0x218   :  { %262 = vsyncpa [#allocation4], 1 }

</bundles_post_ra>
